<compile_context>
chip_gen: v7x
topology: tpu7x:2x2x1
jax: 0.10.0
libtpu: 0.0.40
codegen_flags: <defaults>
</compile_context>

<pallas_src>
import jax
import jax.numpy as jnp
from jax.experimental import pallas as pl
from jax.experimental.pallas import tpu as pltpu

LANE = 128


def _round_up(x, m):
    return (x + m - 1) // m * m


def _main_branch(xr, w1_ref, b1_ref, w2_ref, b2_ref, TL):
    """ReLU'd padded window (TL+8, Cin) -> conv1(k=3) -> ReLU -> conv2(k=1)."""
    h = (jnp.dot(xr[0:TL], w1_ref[0], preferred_element_type=jnp.float32)
         + jnp.dot(xr[1:TL + 1], w1_ref[1], preferred_element_type=jnp.float32)
         + jnp.dot(xr[2:TL + 2], w1_ref[2], preferred_element_type=jnp.float32)
         + b1_ref[...])
    h = jnp.maximum(h, 0.0).astype(w2_ref.dtype)          # bf16 back onto the MXU
    return jnp.dot(h, w2_ref[...], preferred_element_type=jnp.float32) + b2_ref[...]


def _rb_kernel_skip(x_ref, w1_ref, b1_ref, w2_ref, b2_ref, ws_ref, bs_ref, o_ref):
    # x_ref:  (1, L_pad+8, Cin_p) bf16  full zero-padded sequence (resident per n)
    # w1_ref: (3, Cin_p, Cmid_p)  bf16  conv1 taps, per-tap (Cin, Cmid)
    # b1_ref: (1, Cmid_p) f32
    # w2_ref: (Cmid_p, Cout_p) bf16     conv2 (1x1)
    # b2_ref: (1, Cout_p) f32
    # ws_ref: (Cin_p, Cout_p) bf16      skip 1x1 conv
    # bs_ref: (1, Cout_p) f32
    # o_ref:  (1, TL, Cout_p) f32       output tile along length
    TL = o_ref.shape[1]
    start = pl.multiple_of(pl.program_id(1) * TL, TL)      # 8-aligned window start
    xp = x_ref[0, pl.ds(start, TL + 8), :]                  # padded window (TL+8, Cin_p)
    xr = jnp.maximum(xp, 0.0)                               # relu commutes with 0-pad
    residual = (jnp.dot(xp[1:TL + 1], ws_ref[...], preferred_element_type=jnp.float32)
                + bs_ref[...])                              # skip acts on raw (pre-ReLU) x
    out = _main_branch(xr, w1_ref, b1_ref, w2_ref, b2_ref, TL) + residual
    o_ref[0] = out.astype(o_ref.dtype)


def _rb_kernel_identity(x_ref, w1_ref, b1_ref, w2_ref, b2_ref, o_ref):
    # Same as above but skip == Identity: residual is just the center rows of x.
    TL = o_ref.shape[1]
    start = pl.multiple_of(pl.program_id(1) * TL, TL)
    xp = x_ref[0, pl.ds(start, TL + 8), :]
    xr = jnp.maximum(xp, 0.0)
    residual = xp[1:TL + 1].astype(jnp.float32)
    out = _main_branch(xr, w1_ref, b1_ref, w2_ref, b2_ref, TL) + residual
    o_ref[0] = out.astype(o_ref.dtype)


def residual_block_1d(x_ncl, params):
    """x_ncl: (N, C_in, L) float32. Returns (N, C_out, L) float32."""
    w1, b1, w2, b2, ws, bs = params          # ws/bs are None when in_ch == out_ch
    N, Cin, L = x_ncl.shape
    Cmid = w1.shape[2]
    Cout = w2.shape[1]
    identity_skip = ws is None

    # Lane-pad channels to multiples of 128 (zero-padded channels are inert).
    Cin_p = _round_up(Cin, LANE)
    Cmid_p = _round_up(Cmid, LANE)
    Cout_p = _round_up(Cout, LANE)

    # Length tiling: TL output rows per grid step (multiple of 8, <= 512).
    TL = min(512, _round_up(L, 8))
    L_pad = _round_up(L, TL)
    nL = L_pad // TL
    Lp = L_pad + 8            # 1 left halo + (7 + L_pad - L) zeros on the right

    # Glue: NCL -> NLC; one pad covers conv halo, tile rounding and lane padding.
    x_nlc = jnp.transpose(x_ncl, (0, 2, 1))                                  # (N, L, Cin)
    x_pad = jnp.pad(x_nlc, ((0, 0), (1, 7 + L_pad - L), (0, Cin_p - Cin)))   # (N, Lp, Cin_p)
    x_pad = x_pad.astype(jnp.bfloat16)

    w1_p = jnp.pad(w1, ((0, 0), (0, Cin_p - Cin), (0, Cmid_p - Cmid))).astype(jnp.bfloat16)
    b1_p = jnp.pad(b1.reshape(1, -1), ((0, 0), (0, Cmid_p - Cmid))).astype(jnp.float32)
    w2_p = jnp.pad(w2, ((0, Cmid_p - Cmid), (0, Cout_p - Cout))).astype(jnp.bfloat16)
    b2_p = jnp.pad(b2.reshape(1, -1), ((0, 0), (0, Cout_p - Cout))).astype(jnp.float32)

    grid = (N, nL)            # l innermost -> per-batch x block stays VMEM-resident
    common_in_specs = [
        pl.BlockSpec((1, Lp, Cin_p), lambda n, l: (n, 0, 0)),
        pl.BlockSpec((3, Cin_p, Cmid_p), lambda n, l: (0, 0, 0)),
        pl.BlockSpec((1, Cmid_p), lambda n, l: (0, 0)),
        pl.BlockSpec((Cmid_p, Cout_p), lambda n, l: (0, 0)),
        pl.BlockSpec((1, Cout_p), lambda n, l: (0, 0)),
    ]
    out_spec = pl.BlockSpec((1, TL, Cout_p), lambda n, l: (n, l, 0))
    compiler_params = pltpu.CompilerParams(
        dimension_semantics=("parallel", "parallel"),   # independent output tiles
        vmem_limit_bytes=64 * 1024 * 1024,
    )
    out_shape = jax.ShapeDtypeStruct((N, L_pad, Cout_p), jnp.float32)

    if identity_skip:
        out_nlc = pl.pallas_call(
            _rb_kernel_identity,
            out_shape=out_shape,
            grid_spec=pltpu.PrefetchScalarGridSpec(
                num_scalar_prefetch=0, grid=grid,
                in_specs=common_in_specs, out_specs=out_spec),
            compiler_params=compiler_params,
        )(x_pad, w1_p, b1_p, w2_p, b2_p)
    else:
        ws_p = jnp.pad(ws, ((0, Cin_p - Cin), (0, Cout_p - Cout))).astype(jnp.bfloat16)
        bs_p = jnp.pad(bs.reshape(1, -1), ((0, 0), (0, Cout_p - Cout))).astype(jnp.float32)
        in_specs = common_in_specs + [
            pl.BlockSpec((Cin_p, Cout_p), lambda n, l: (0, 0)),
            pl.BlockSpec((1, Cout_p), lambda n, l: (0, 0)),
        ]
        out_nlc = pl.pallas_call(
            _rb_kernel_skip,
            out_shape=out_shape,
            grid_spec=pltpu.PrefetchScalarGridSpec(
                num_scalar_prefetch=0, grid=grid,
                in_specs=in_specs, out_specs=out_spec),
            compiler_params=compiler_params,
        )(x_pad, w1_p, b1_p, w2_p, b2_p, ws_p, bs_p)

    out = out_nlc[:, :L, :Cout]
    return jnp.transpose(out, (0, 2, 1))                  # back to (N, Cout, L)


def make_params(key, in_channels, out_channels, mid_channels=None):
    """Deterministic synthetic parameters matching nn.Conv1d shapes."""
    if mid_channels is None:
        mid_channels = out_channels
    ks = jax.random.split(key, 6)
    # torch conv1 weight: (mid, in, 3) -> per-tap (in, mid)
    w1_t = jax.random.normal(ks[0], (mid_channels, in_channels, 3), jnp.float32) * 0.1
    b1 = jax.random.normal(ks[1], (mid_channels,), jnp.float32) * 0.1
    # torch conv2 weight: (out, mid, 1) -> (mid, out)
    w2_t = jax.random.normal(ks[2], (out_channels, mid_channels, 1), jnp.float32) * 0.1
    b2 = jax.random.normal(ks[3], (out_channels,), jnp.float32) * 0.1
    w1 = jnp.transpose(w1_t, (2, 1, 0))                    # (3, in, mid)
    w2 = jnp.transpose(w2_t[:, :, 0], (1, 0))              # (mid, out)
    if in_channels != out_channels:
        ws_t = jax.random.normal(ks[4], (out_channels, in_channels, 1), jnp.float32) * 0.1
        bs = jax.random.normal(ks[5], (out_channels,), jnp.float32) * 0.1
        ws = jnp.transpose(ws_t[:, :, 0], (1, 0))          # (in, out)
    else:
        ws, bs = None, None                                # identity skip (specialized kernel)
    return (w1, b1, w2, b2, ws, bs)


def reference_jax(x_ncl, params):
    """Pure-JAX f32 reference of the PyTorch forward, for verification only."""
    w1, b1, w2, b2, ws, bs = params
    x_nlc = jnp.transpose(x_ncl, (0, 2, 1))
    residual = x_nlc if ws is None else x_nlc @ ws + bs
    xr = jnp.maximum(x_nlc, 0.0)
    xp = jnp.pad(xr, ((0, 0), (1, 1), (0, 0)))
    L = x_nlc.shape[1]
    h = xp[:, 0:L] @ w1[0] + xp[:, 1:L + 1] @ w1[1] + xp[:, 2:L + 2] @ w1[2] + b1
    h = jnp.maximum(h, 0.0)
    out = h @ w2 + b2 + residual
    return jnp.transpose(out, (0, 2, 1))


if __name__ == "__main__":
    key = jax.random.PRNGKey(0)
    k1, k2, k3, k4 = jax.random.split(key, 4)

    # Kernel computes matmuls with bf16 inputs (f32 accumulation); reference is
    # pure f32, so compare with a bf16-appropriate tolerance.
    TOL = 5e-2

    # Case 1: in_channels != out_channels -> 1x1 skip-conv kernel variant.
    N, Cin, Cout, L = 2, 4, 8, 16
    x = jax.random.normal(k1, (N, Cin, L), jnp.float32)
    params = make_params(k2, Cin, Cout)
    out = jax.block_until_ready(residual_block_1d(x, params))
    ref = reference_jax(x, params)
    assert out.shape == (N, Cout, L)
    assert jnp.allclose(out, ref, atol=TOL, rtol=TOL), "skip-conv path mismatch vs reference"

    # Case 2: in_channels == out_channels -> identity-skip kernel variant.
    C = 8
    x2 = jax.random.normal(k3, (N, C, L), jnp.float32)
    params2 = make_params(k4, C, C)
    out2 = jax.block_until_ready(residual_block_1d(x2, params2))
    ref2 = reference_jax(x2, params2)
    assert out2.shape == (N, C, L)
    assert jnp.allclose(out2, ref2, atol=TOL, rtol=TOL), "identity path mismatch vs reference"

    print("KERNEL_OK")
</pallas_src>

<mosaic_0001>
module attributes {stable_mosaic.version = 11 : i64} {
  func.func @_rb_kernel_skip(%arg0: i32, %arg1: i32, %arg2: memref<1x24x128xbf16, #tpu.memory_space<vmem>>, %arg3: memref<3x128x128xbf16, #tpu.memory_space<vmem>>, %arg4: memref<1x128xf32, #tpu.memory_space<vmem>>, %arg5: memref<128x128xbf16, #tpu.memory_space<vmem>>, %arg6: memref<1x128xf32, #tpu.memory_space<vmem>>, %arg7: memref<128x128xbf16, #tpu.memory_space<vmem>>, %arg8: memref<1x128xf32, #tpu.memory_space<vmem>>, %arg9: memref<1x16x128xf32, #tpu.memory_space<vmem>>) attributes {dimension_semantics = [#tpu.dimension_semantics<parallel>, #tpu.dimension_semantics<parallel>], iteration_bounds = array<i64: 2, 1>, scalar_prefetch = 0 : i64, scratch_operands = 0 : i64, tpu.core_type = #tpu.core_type<tc>, window_params = [{transform_indices = @transform_0, window_bounds = array<i64: 1, 24, 128>}, {pipeline_mode = #tpu.pipeline_mode<synchronous>, transform_indices = @transform_1, window_bounds = array<i64: 3, 128, 128>}, {pipeline_mode = #tpu.pipeline_mode<synchronous>, transform_indices = @transform_2, window_bounds = array<i64: 1, 128>}, {pipeline_mode = #tpu.pipeline_mode<synchronous>, transform_indices = @transform_3, window_bounds = array<i64: 128, 128>}, {pipeline_mode = #tpu.pipeline_mode<synchronous>, transform_indices = @transform_4, window_bounds = array<i64: 1, 128>}, {pipeline_mode = #tpu.pipeline_mode<synchronous>, transform_indices = @transform_5, window_bounds = array<i64: 128, 128>}, {pipeline_mode = #tpu.pipeline_mode<synchronous>, transform_indices = @transform_6, window_bounds = array<i64: 1, 128>}, {transform_indices = @transform_7, window_bounds = array<i64: 1, 16, 128>}]} {
    %c16_i32 = arith.constant 16 : i32
    %0 = arith.muli %arg1, %c16_i32 : i32
    %1 = tpu.assume_multiple %0, 16 : i32
    %c0 = arith.constant 0 : index
    %2 = arith.index_cast %1 : i32 to index
    %c0_0 = arith.constant 0 : index
    %3 = vector.load %arg2[%c0, %2, %c0_0] : memref<1x24x128xbf16, #tpu.memory_space<vmem>>, vector<1x24x128xbf16>
    %4 = vector.shape_cast %3 : vector<1x24x128xbf16> to vector<24x128xbf16>
    %cst = arith.constant 0.000000e+00 : bf16
    %5 = vector.broadcast %cst : bf16 to vector<24x128xbf16>
    %6 = arith.maximumf %4, %5 : vector<24x128xbf16>
    %7 = vector.extract_strided_slice %4 {offsets = [1, 0], sizes = [16, 128], strides = [1, 1]} : vector<24x128xbf16> to vector<16x128xbf16>
    %c0_1 = arith.constant 0 : index
    %c0_2 = arith.constant 0 : index
    %8 = vector.load %arg7[%c0_1, %c0_2] : memref<128x128xbf16, #tpu.memory_space<vmem>>, vector<128x128xbf16>
    %cst_3 = arith.constant dense<0.000000e+00> : vector<16x128xf32>
    %9 = tpu.matmul %7, %8, %cst_3 {dimension_numbers = #tpu.dot_dimension_numbers<[1], [0], [0], [1], [0, 0, 1, 1], [], []>} : vector<16x128xbf16>, vector<128x128xbf16>, vector<16x128xf32> -> vector<16x128xf32>
    %c0_4 = arith.constant 0 : index
    %c0_5 = arith.constant 0 : index
    %10 = vector.load %arg8[%c0_4, %c0_5] : memref<1x128xf32, #tpu.memory_space<vmem>>, vector<1x128xf32>
    %11 = vector.broadcast %10 : vector<1x128xf32> to vector<16x128xf32>
    %12 = arith.addf %9, %11 : vector<16x128xf32>
    %13 = vector.extract_strided_slice %6 {offsets = [0, 0], sizes = [16, 128], strides = [1, 1]} : vector<24x128xbf16> to vector<16x128xbf16>
    %c0_6 = arith.constant 0 : index
    %c0_7 = arith.constant 0 : index
    %c0_8 = arith.constant 0 : index
    %14 = vector.load %arg3[%c0_6, %c0_7, %c0_8] : memref<3x128x128xbf16, #tpu.memory_space<vmem>>, vector<1x128x128xbf16>
    %15 = vector.shape_cast %14 : vector<1x128x128xbf16> to vector<128x128xbf16>
    %cst_9 = arith.constant dense<0.000000e+00> : vector<16x128xf32>
    %16 = tpu.matmul %13, %15, %cst_9 {dimension_numbers = #tpu.dot_dimension_numbers<[1], [0], [0], [1], [0, 0, 1, 1], [], []>} : vector<16x128xbf16>, vector<128x128xbf16>, vector<16x128xf32> -> vector<16x128xf32>
    %17 = vector.extract_strided_slice %6 {offsets = [1, 0], sizes = [16, 128], strides = [1, 1]} : vector<24x128xbf16> to vector<16x128xbf16>
    %c1 = arith.constant 1 : index
    %c0_10 = arith.constant 0 : index
    %c0_11 = arith.constant 0 : index
    %18 = vector.load %arg3[%c1, %c0_10, %c0_11] : memref<3x128x128xbf16, #tpu.memory_space<vmem>>, vector<1x128x128xbf16>
    %19 = vector.shape_cast %18 : vector<1x128x128xbf16> to vector<128x128xbf16>
    %cst_12 = arith.constant dense<0.000000e+00> : vector<16x128xf32>
    %20 = tpu.matmul %17, %19, %cst_12 {dimension_numbers = #tpu.dot_dimension_numbers<[1], [0], [0], [1], [0, 0, 1, 1], [], []>} : vector<16x128xbf16>, vector<128x128xbf16>, vector<16x128xf32> -> vector<16x128xf32>
    %21 = arith.addf %16, %20 : vector<16x128xf32>
    %22 = vector.extract_strided_slice %6 {offsets = [2, 0], sizes = [16, 128], strides = [1, 1]} : vector<24x128xbf16> to vector<16x128xbf16>
    %c2 = arith.constant 2 : index
    %c0_13 = arith.constant 0 : index
    %c0_14 = arith.constant 0 : index
    %23 = vector.load %arg3[%c2, %c0_13, %c0_14] : memref<3x128x128xbf16, #tpu.memory_space<vmem>>, vector<1x128x128xbf16>
    %24 = vector.shape_cast %23 : vector<1x128x128xbf16> to vector<128x128xbf16>
    %cst_15 = arith.constant dense<0.000000e+00> : vector<16x128xf32>
    %25 = tpu.matmul %22, %24, %cst_15 {dimension_numbers = #tpu.dot_dimension_numbers<[1], [0], [0], [1], [0, 0, 1, 1], [], []>} : vector<16x128xbf16>, vector<128x128xbf16>, vector<16x128xf32> -> vector<16x128xf32>
    %26 = arith.addf %21, %25 : vector<16x128xf32>
    %c0_16 = arith.constant 0 : index
    %c0_17 = arith.constant 0 : index
    %27 = vector.load %arg4[%c0_16, %c0_17] : memref<1x128xf32, #tpu.memory_space<vmem>>, vector<1x128xf32>
    %28 = vector.broadcast %27 : vector<1x128xf32> to vector<16x128xf32>
    %29 = arith.addf %26, %28 : vector<16x128xf32>
    %cst_18 = arith.constant 0.000000e+00 : f32
    %30 = vector.broadcast %cst_18 : f32 to vector<16x128xf32>
    %31 = arith.maximumf %29, %30 : vector<16x128xf32>
    %32 = arith.truncf %31 : vector<16x128xf32> to vector<16x128xbf16>
    %c0_19 = arith.constant 0 : index
    %c0_20 = arith.constant 0 : index
    %33 = vector.load %arg5[%c0_19, %c0_20] : memref<128x128xbf16, #tpu.memory_space<vmem>>, vector<128x128xbf16>
    %cst_21 = arith.constant dense<0.000000e+00> : vector<16x128xf32>
    %34 = tpu.matmul %32, %33, %cst_21 {dimension_numbers = #tpu.dot_dimension_numbers<[1], [0], [0], [1], [0, 0, 1, 1], [], []>} : vector<16x128xbf16>, vector<128x128xbf16>, vector<16x128xf32> -> vector<16x128xf32>
    %c0_22 = arith.constant 0 : index
    %c0_23 = arith.constant 0 : index
    %35 = vector.load %arg6[%c0_22, %c0_23] : memref<1x128xf32, #tpu.memory_space<vmem>>, vector<1x128xf32>
    %36 = vector.broadcast %35 : vector<1x128xf32> to vector<16x128xf32>
    %37 = arith.addf %34, %36 : vector<16x128xf32>
    %38 = arith.addf %37, %12 : vector<16x128xf32>
    %c0_24 = arith.constant 0 : index
    %c0_25 = arith.constant 0 : index
    %c0_26 = arith.constant 0 : index
    %39 = vector.load %arg9[%c0_24, %c0_25, %c0_26] : memref<1x16x128xf32, #tpu.memory_space<vmem>>, vector<1x16x128xf32>
    %40 = vector.shape_cast %39 : vector<1x16x128xf32> to vector<16x128xf32>
    %41 = vector.shape_cast %38 : vector<16x128xf32> to vector<1x16x128xf32>
    tpu.vector_store %arg9[%c0_24, %c0_25, %c0_26], %41 {strides = array<i32>} : memref<1x16x128xf32, #tpu.memory_space<vmem>>, vector<1x16x128xf32>,
    return
  }
  func.func @transform_0(%arg0: i32, %arg1: i32) -> (i32, i32, i32) {
    %c0_i32 = arith.constant 0 : i32
    %c0_i32_0 = arith.constant 0 : i32
    %c0_i32_1 = arith.constant 0 : i32
    return %arg0, %c0_i32, %c0_i32_0 : i32, i32, i32
  }
  func.func @transform_1(%arg0: i32, %arg1: i32) -> (i32, i32, i32) {
    %c0_i32 = arith.constant 0 : i32
    %c0_i32_0 = arith.constant 0 : i32
    %c0_i32_1 = arith.constant 0 : i32
    %c0_i32_2 = arith.constant 0 : i32
    return %c0_i32, %c0_i32_0, %c0_i32_1 : i32, i32, i32
  }
  func.func @transform_2(%arg0: i32, %arg1: i32) -> (i32, i32) {
    %c0_i32 = arith.constant 0 : i32
    %c0_i32_0 = arith.constant 0 : i32
    %c0_i32_1 = arith.constant 0 : i32
    return %c0_i32, %c0_i32_0 : i32, i32
  }
  func.func @transform_3(%arg0: i32, %arg1: i32) -> (i32, i32) {
    %c0_i32 = arith.constant 0 : i32
    %c0_i32_0 = arith.constant 0 : i32
    %c0_i32_1 = arith.constant 0 : i32
    return %c0_i32, %c0_i32_0 : i32, i32
  }
  func.func @transform_4(%arg0: i32, %arg1: i32) -> (i32, i32) {
    %c0_i32 = arith.constant 0 : i32
    %c0_i32_0 = arith.constant 0 : i32
    %c0_i32_1 = arith.constant 0 : i32
    return %c0_i32, %c0_i32_0 : i32, i32
  }
  func.func @transform_5(%arg0: i32, %arg1: i32) -> (i32, i32) {
    %c0_i32 = arith.constant 0 : i32
    %c0_i32_0 = arith.constant 0 : i32
    %c0_i32_1 = arith.constant 0 : i32
    return %c0_i32, %c0_i32_0 : i32, i32
  }
  func.func @transform_6(%arg0: i32, %arg1: i32) -> (i32, i32) {
    %c0_i32 = arith.constant 0 : i32
    %c0_i32_0 = arith.constant 0 : i32
    %c0_i32_1 = arith.constant 0 : i32
    return %c0_i32, %c0_i32_0 : i32, i32
  }
  func.func @transform_7(%arg0: i32, %arg1: i32) -> (i32, i32, i32) {
    %c0_i32 = arith.constant 0 : i32
    %c0_i32_0 = arith.constant 0 : i32
    return %arg0, %arg1, %c0_i32 : i32, i32, i32
  }
}

</mosaic_0001>

<bundles_post_ra>
// kernel: tpu_custom_call.1
= control target key start
LH: loop header
LB: loop body
LE: loop exit
PB: predicated region body
PF: predicated region fallthrough
CT: control target
= control target key end

     0   :  { %s2339_s0 = inlined_call_operand.hbm [shape: bf16[2,24,128], index: 0, kind: input, shape index: {}]   ;;  %s2340_s1 = inlined_call_operand.hbm [shape: bf16[3,128,128], index: 1, kind: input, shape index: {}]   ;;  %s2341_s2 = inlined_call_operand.hbm [shape: f32[1,128], index: 2, kind: input, shape index: {}]   ;;  %s2342_s3 = inlined_call_operand.hbm [shape: bf16[128,128], index: 3, kind: input, shape index: {}]   ;;  %s2343_s4 = inlined_call_operand.hbm [shape: f32[1,128], index: 4, kind: input, shape index: {}]   ;;  %s2344_s5 = inlined_call_operand.hbm [shape: bf16[128,128], index: 5, kind: input, shape index: {}]   ;;  %s2345_s6 = inlined_call_operand.hbm [shape: f32[1,128], index: 6, kind: input, shape index: {}]   ;;  %s2346_s7 = inlined_call_operand.hbm [shape: f32[2,16,128], index: 7, kind: output, shape index: {}]  }
   0x1   :  { %2355 = sst [smem:[#allocation20_spill]] %s2340_s1 }
   0x2   :  { %2356 = sst [smem:[#allocation21_spill]] %s2341_s2 }
   0x3   :  { %2357 = sst [smem:[#allocation22_spill]] %s2346_s7 }
   0x4   :  { %12 = vsyncpa [#allocation3], 0 }
   0x5   :  { %14 = vsyncpa [#allocation3 + $0x1], 0 }
   0x6   :  { %15 = vsyncpa [#allocation6], 0 }
   0x7   :  { %16 = vsyncpa [#allocation9], 0 }
   0x8   :  { %17 = vsyncpa [#allocation12], 0 }
   0x9   :  { %18 = vsyncpa [#allocation4], 0 }
   0xa   :  { %20 = vsyncpa [#allocation4 + $0x1], 0  ;;  %s1921_s24 = smov 0   ;;  %s1923_s25 = smov 0  }
   0xb   :  { %s1925_s26 = smov 0   ;;  %s1927_s27 = smov 0  }
   0xc   :  { %s1929_s28 = smov 0   ;;  %s1931_s29 = smov 0  }
   0xd LB: > { %s2347_s30 = sadd.s32 4294967295, %s1864_s29   ;;  %p1174_p0 = scmp.ge.s32.totalorder %s1864_s29, 1  ;;  %s1864_s29 = sphi %s1931_s29, %s26_s29   ;;  %s1860_s28 = sphi %s1929_s28, %s2383_s28   ;;  %s1856_s27 = sphi %s1927_s27, %s2382_s27   ;;  %s1852_s26 = sphi %s1925_s26, %s2381_s26   ;;  %s1848_s25 = sphi %s1923_s25, %s2380_s25   ;;  %s1844_s24 = sphi %s1921_s24, %s2379_s24  }
   0xe   : > { %p1955_p1 = scmp.eq.s32.totalorder %s2347_s30, 0  ;;  %p223_p2 = scmp.lt.s32.totalorder %s1864_s29, 3 }
   0xf   : > { %s1866_s10 = smov [#allocation5]   ;;  %s1867_s13 = smov [#allocation8]  }
  0x10   : > { %s2358_s8 = scalar_select %p1955_p1, 1, 0 }
  0x11   : > { %p1960_p3 = pnand %p1174_p0, %p223_p2  ;;  %s235_s11 = sshll.u32 %s1866_s10, 4  ;;  %s1964_s11 = int_to_ptr.vmem [resolvable:$true] %s235_s11 }
  0x12   : > { %s259_s14 = sshll.u32 %s1867_s13, 4  ;;  %s1868_s15 = smov [#allocation11]   ;;  %s1975_s14 = int_to_ptr.vmem [resolvable:$true] %s259_s14 }
  0x13   : > { %s2359_s9 = scalar_select %p1960_p3, 1, 0 }
  0x14   : > { %p1428_p4 = pneg %p1960_p3  ;;  %s1977_s16 = sshll.u32 %s1868_s15, 4  ;;  %s284_s16 = int_to_ptr.vmem [resolvable:$true] %s1977_s16 }
  0x15   : > { %s2361_s1 = sld [smem:[#allocation20_spill]] }
  0x16   : > { %p1971_p6 = pnand %p1428_p4, %p1955_p1 }
  0x18   : > { %p1987_p8 = pneg %p1971_p6 }
  0x1b   : > { %s1572_s19 = scalar_lea.hbm %s2361_s1, 3072 }
  0x1c   : > { %p1573_p7 = scmp.ne.s32.totalorder %s2361_s1, %s1572_s19  ;;  %p1579_p11 = scmp.lt.u32.totalorder %s1572_s19, %s2361_s1 }
  0x1e   : > { %p1575_p9 = pnand %p1987_p8, %p1573_p7 }
  0x20   : > { %p1576_p10 = pneg %p1575_p9 }
  0x22   : > { %p1581_p12 = pnand %p1579_p11, %p1576_p10 }
  0x24   : > { %1584 = shalt.err (!%p1581_p12)
}
  0x25   : > { %s1585_s13 = scalar_lea.vmem %s1964_s11, 3072  ;;  %p1593_p4 = scmp.lt.s32.totalorder %s1964_s11, %s1964_s11 }
  0x26   : > { %p1586_p13 = scmp.ne.s32.totalorder %s1964_s11, %s1585_s13  ;;  %p1594_p5 = scmp.lt.s32.totalorder %s1585_s13, %s1585_s13 }
  0x28   : > { %p1588_p0 = pnand %p1586_p13, %p1987_p8  ;;  %p1595_p7 = por %p1594_p5, %p1593_p4 }
  0x2a   : > { %p1589_p2 = pneg %p1588_p0 }
  0x2c   : > { %p1596_p9 = pnand %p1595_p7, %p1589_p2 }
  0x2e   : > { %1599 = shalt.err (!%p1596_p9)
}
  0x2f   : > { %s2352_s15 = smov 64   ;;  %s2353_s17 = smov 4  }
  0x30   : > { %1431 = dma.hbm_to_vmem [thread:$0]  (!%p1971_p6), %s2361_s1, 3072, %s1964_s11, [#allocation6], %s2352_s15, %s2352_s15, %s2353_s17  }
  0x31   : > { %s1600_s23 = scalar_lea.hbm %s2342_s3, 1024 }
  0x32   : > { %p1601_p5 = scmp.ne.s32.totalorder %s2342_s3, %s1600_s23  ;;  %p1607_p12 = scmp.lt.u32.totalorder %s1600_s23, %s2342_s3 }
  0x34   : > { %p1603_p10 = pnand %p1601_p5, %p1987_p8 }
  0x36   : > { %p1604_p11 = pneg %p1603_p10 }
  0x38   : > { %p1609_p13 = pnand %p1607_p12, %p1604_p11 }
  0x3a   : > { %1612 = shalt.err (!%p1609_p13)
}
  0x3b   : > { %s1613_s11 = scalar_lea.vmem %s1975_s14, 1024  ;;  %p1621_p7 = scmp.lt.s32.totalorder %s1975_s14, %s1975_s14 }
  0x3c   : > { %p1614_p0 = scmp.ne.s32.totalorder %s1975_s14, %s1613_s11  ;;  %p1622_p9 = scmp.lt.s32.totalorder %s1613_s11, %s1613_s11 }
  0x3e   : > { %p1616_p2 = pnand %p1614_p0, %p1987_p8  ;;  %p1623_p5 = por %p1622_p9, %p1621_p7 }
  0x40   : > { %p1617_p4 = pneg %p1616_p2 }
  0x42   : > { %p1624_p10 = pnand %p1623_p5, %p1617_p4 }
  0x44   : > { %1627 = shalt.err (!%p1624_p10)
}
  0x45   : > { %1437 = dma.hbm_to_vmem [thread:$0]  (!%p1971_p6), %s2342_s3, 1024, %s1975_s14, [#allocation9], %s2352_s15, %s2352_s15, %s2353_s17  }
  0x46   : > { %s1628_s20 = scalar_lea.hbm %s2344_s5, 1024 }
  0x47   : > { %p1629_p11 = scmp.ne.s32.totalorder %s2344_s5, %s1628_s20  ;;  %p1635_p0 = scmp.lt.u32.totalorder %s1628_s20, %s2344_s5 }
  0x49   : > { %p1631_p12 = pnand %p1629_p11, %p1987_p8 }
  0x4b   : > { %p1632_p13 = pneg %p1631_p12 }
  0x4d   : > { %p1637_p2 = pnand %p1635_p0, %p1632_p13 }
  0x4f   : > { %1640 = shalt.err (!%p1637_p2)
}
  0x50   : > { %s1641_s11 = scalar_lea.vmem %s284_s16, 1024  ;;  %p1649_p5 = scmp.lt.s32.totalorder %s284_s16, %s284_s16 }
  0x51   : > { %p1642_p4 = scmp.ne.s32.totalorder %s284_s16, %s1641_s11  ;;  %p1650_p10 = scmp.lt.s32.totalorder %s1641_s11, %s1641_s11 }
  0x53   : > { %p1644_p7 = pnand %p1642_p4, %p1987_p8  ;;  %p1651_p3 = por %p1650_p10, %p1649_p5 }
  0x55   : > { %p1645_p9 = pneg %p1644_p7 }
  0x57   : > { %p1652_p1 = pnand %p1651_p3, %p1645_p9 }
  0x59   : > { %1655 = shalt.err (!%p1652_p1)
}
  0x5a   : > { %1443 = dma.hbm_to_vmem [thread:$0]  (!%p1971_p6), %s2344_s5, 1024, %s284_s16, [#allocation12], %s2352_s15, %s2352_s15, %s2353_s17  }
  0x5b   : > { %s1871_s30 = smov [#allocation7]   ;;  %s1872_s19 = smov [#allocation10]  }
  0x5c   : > { %s249_s18 = sshll.u32 %s1871_s30, 4  ;;  %s273_s20 = sshll.u32 %s1872_s19, 4  ;;  %s250_s18 = int_to_ptr.vmem [resolvable:$true] %s249_s18  ;;  %s274_s20 = int_to_ptr.vmem [resolvable:$true] %s273_s20 }
  0x5d   : > { %s2363_s2 = sld [smem:[#allocation21_spill]] }
  0x63   : > { %s1656_s10 = scalar_lea.hbm %s2363_s2, 16 }
  0x64   : > { %p1657_p1 = scmp.ne.s32.totalorder %s2363_s2, %s1656_s10  ;;  %p1663_p12 = scmp.lt.u32.totalorder %s1656_s10, %s2363_s2 }
  0x66   : > { %p1659_p3 = pnand %p1657_p1, %p1987_p8 }
  0x68   : > { %p1660_p11 = pneg %p1659_p3 }
  0x6a   : > { %p1665_p13 = pnand %p1663_p12, %p1660_p11 }
  0x6c   : > { %1668 = shalt.err (!%p1665_p13)
}
  0x6d   : > { %s1669_s16 = scalar_lea.vmem %s250_s18, 16  ;;  %s1676_s7 = scalar_lea.vmem %s250_s18, 32 }
  0x6e   : > { %p1670_p0 = scmp.ne.s32.totalorder %s250_s18, %s1669_s16  ;;  %p1677_p7 = scmp.lt.s32.totalorder %s250_s18, %s250_s18 }
  0x6f   : > { %p1678_p9 = scmp.lt.s32.totalorder %s1676_s7, %s1669_s16 }
  0x70   : > { %p1672_p2 = pnand %p1670_p0, %p1987_p8 }
  0x71   : > { %p1679_p5 = por %p1678_p9, %p1677_p7 }
  0x72   : > { %p1673_p4 = pneg %p1672_p2 }
  0x74   : > { %p1680_p10 = pnand %p1679_p5, %p1673_p4 }
  0x76   : > { %1683 = shalt.err (!%p1680_p10)
}
  0x77   : > { %1434 = dma.hbm_to_vmem [thread:$0]  (!%p1971_p6), %s2363_s2, 16, %s250_s18, [#allocation6]  }
  0x78   : > { %s1684_s23 = scalar_lea.hbm %s2343_s4, 16 }
  0x79   : > { %p1685_p1 = scmp.ne.s32.totalorder %s2343_s4, %s1684_s23  ;;  %p1691_p12 = scmp.lt.u32.totalorder %s1684_s23, %s2343_s4 }
  0x7b   : > { %p1687_p3 = pnand %p1685_p1, %p1987_p8 }
  0x7d   : > { %p1688_p11 = pneg %p1687_p3 }
  0x7f   : > { %p1693_p13 = pnand %p1691_p12, %p1688_p11 }
  0x81   : > { %1696 = shalt.err (!%p1693_p13)
}
  0x82   : > { %s1697_s16 = scalar_lea.vmem %s274_s20, 16  ;;  %s1704_s18 = scalar_lea.vmem %s274_s20, 32 }
  0x83   : > { %p1698_p0 = scmp.ne.s32.totalorder %s274_s20, %s1697_s16  ;;  %p1705_p7 = scmp.lt.s32.totalorder %s274_s20, %s274_s20 }
  0x84   : > { %p1706_p9 = scmp.lt.s32.totalorder %s1704_s18, %s1697_s16 }
  0x85   : > { %p1700_p2 = pnand %p1698_p0, %p1987_p8 }
  0x86   : > { %p1707_p5 = por %p1706_p9, %p1705_p7 }
  0x87   : > { %p1701_p4 = pneg %p1700_p2 }
  0x89   : > { %p1708_p10 = pnand %p1707_p5, %p1701_p4 }
  0x8b   : > { %1711 = shalt.err (!%p1708_p10)
}
  0x8c   : > { %1440 = dma.hbm_to_vmem [thread:$0]  (!%p1971_p6), %s2343_s4, 16, %s274_s20, [#allocation9]  }
  0x8d   : > { %s1873_s19 = smov [#allocation13]   ;;  %s1712_s10 = scalar_lea.hbm %s2345_s6, 16 }
  0x8e   : > { %s297_s1 = sshll.u32 %s1873_s19, 4  ;;  %p1713_p1 = scmp.ne.s32.totalorder %s2345_s6, %s1712_s10  ;;  %s298_s1 = int_to_ptr.vmem [resolvable:$true] %s297_s1 }
  0x8f   : > { %p1719_p12 = scmp.lt.u32.totalorder %s1712_s10, %s2345_s6 }
  0x90   : > { %p1715_p3 = pnand %p1713_p1, %p1987_p8 }
  0x92   : > { %p1716_p11 = pneg %p1715_p3 }
  0x94   : > { %p1721_p13 = pnand %p1719_p12, %p1716_p11 }
  0x96   : > { %1724 = shalt.err (!%p1721_p13)
}
  0x97   : > { %s1725_s20 = scalar_lea.vmem %s298_s1, 16  ;;  %s1732_s18 = scalar_lea.vmem %s298_s1, 32 }
  0x98   : > { %p1726_p0 = scmp.ne.s32.totalorder %s298_s1, %s1725_s20  ;;  %p1733_p7 = scmp.lt.s32.totalorder %s298_s1, %s298_s1 }
  0x99   : > { %p1734_p9 = scmp.lt.s32.totalorder %s1732_s18, %s1725_s20 }
  0x9a   : > { %p1728_p2 = pnand %p1726_p0, %p1987_p8 }
  0x9b   : > { %p1735_p5 = por %p1734_p9, %p1733_p7 }
  0x9c   : > { %p1729_p4 = pneg %p1728_p2 }
  0x9e   : > { %p1736_p10 = pnand %p1735_p5, %p1729_p4 }
  0xa0   : > { %1739 = shalt.err (!%p1736_p10)
}
  0xa1   : > { %1446 = dma.hbm_to_vmem [thread:$0]  (!%p1971_p6), %s2345_s6, 16, %s298_s1, [#allocation12]  }
  0xa2   : > { %s1173_s22 = sadd.s32 4294967294, %s1864_s29   ;;  %s38_s19 = sadd.s32 1, %s1860_s28 }
  0xa3   : > { %p40_p8 = scmp.ge.s32.totalorder %s38_s19, 2  ;;  %s45_s12 = sadd.s32 1, %s1852_s26 }
  0xa4   : > { %p52_p1 = scmp.ne.s32.totalorder %s1852_s26, %s1848_s25  ;;  %p53_p3 = scmp.eq.s32.totalorder %s1864_s29, 0 }
  0xa5   : > { %s2385_s19 = smov (%p40_p8, %s38_s19), 0  ;;  %p58_p12 = scmp.ne.s32.totalorder %s1848_s25, %s1844_s24 }
  0xa6   : > { %p2121_p11 = por %p53_p3, %p52_p1  ;;  %s42_s1 = ssub.s32 %s1860_s28, %s2385_s19 }
  0xa7   : > { %s2365_s23 = sadd.s32 4294967295, %s1864_s29   ;;  %p43_p13 = scmp.eq.s32.totalorder %s42_s1, 0 }
  0xa8   : > { %p210_p6 = scmp.eq.s32.totalorder %s2365_s23, 1  ;;  %p2366_p0 = scmp.ne.s32.totalorder %s2358_s8, 0 }
  0xa9   : > { %p216_p7 = scmp.eq.s32.totalorder %s1173_s22, 1  ;;  %p1461_p5 = scmp.lt.s32.totalorder %s1864_s29, 2 }
  0xaa   : > { %p2133_p2 = por %p2366_p0, %p58_p12  ;;  %p2137_p4 = por %p210_p6, %p52_p1 }
  0xab   : > { %s2142_s11 = scalar_select %p43_p13, %s1852_s26, %s45_s12  }
  0xac   : > { %s2368_s13 = scalar_select %p2137_p4, 1, 0 }
  0xad   : > { %p2144_p9 = por %p216_p7, %p58_p12  ;;  %s308_s16 = sand.u32 1, %s1852_s26  }
  0xae   : > { %s1398_s20 = smul.u32 192, %s1860_s28  ;;  %p2153_p10 = pnand %p1461_p5, %p2121_p11 }
  0xaf   : > { %s2369_s14 = scalar_select %p2144_p9, 1, 0 }
  0xb0   : > { %s1397_s18 = smul.u32 12, %s308_s16  ;;  %s2160_s22 = scalar_lea.hbm %s2339_s0, %s1398_s20 }
  0xb1   : > { %s2164_s21 = scalar_lea.sflag [#allocation3], %s308_s16  ;;  %s1740_s15 = scalar_lea.hbm %s2160_s22, 192 }
  0xb2   : > { %s312_s12 = scalar_lea.vmem [#allocation2], %s1397_s18  ;;  %p1741_p8 = scmp.ne.s32.totalorder %s2160_s22, %s1740_s15 }
  0xb3   : > { %s319_s23 = sshll.u32 %s312_s12, 4  ;;  %p1742_p1 = pneg %p2153_p10  ;;  %s2162_s23 = int_to_ptr.vmem [resolvable:$true] %s319_s23 }
  0xb4   : > { %s1745_s1 = scalar_lea.hbm %s2339_s0, 384  ;;  %p1746_p12 = scmp.lt.u32.totalorder %s2160_s22, %s2339_s0 }
  0xb5   : > { %p1743_p3 = pnand %p1742_p1, %p1741_p8  ;;  %p1747_p6 = scmp.lt.u32.totalorder %s1745_s1, %s1740_s15 }
  0xb6   : > { %p1749_p0 = scmp.lt.u32.totalorder %s1740_s15, %s2160_s22 }
  0xb7   : > { %p1744_p11 = pneg %p1743_p3  ;;  %p1748_p13 = por %p1747_p6, %p1746_p12 }
  0xb9   : > { %p1750_p7 = por %p1749_p0, %p1748_p13 }
  0xbb   : > { %p1751_p5 = pnand %p1750_p7, %p1744_p11 }
  0xbd   : > { %1754 = shalt.err (!%p1751_p5)
}
  0xbe   : > { %s1755_s16 = scalar_lea.vmem %s2162_s23, 192  ;;  %s1874_s18 = smov [#allocation2]  }
  0xbf   : > { %p1756_p8 = scmp.ne.s32.totalorder %s2162_s23, %s1755_s16  ;;  %s1760_s12 = sshll.u32 %s1874_s18, 4  ;;  %s1761_s12 = int_to_ptr.vmem [resolvable:$false] %s1760_s12 }
  0xc0   : > { %s1762_s2 = scalar_lea.vmem %s1761_s12, 384  ;;  %p1763_p4 = scmp.lt.s32.totalorder %s2162_s23, %s1761_s12 }
  0xc1   : > { %p1758_p3 = pnand %p1756_p8, %p1742_p1  ;;  %p1764_p12 = scmp.lt.s32.totalorder %s1762_s2, %s1755_s16 }
  0xc3   : > { %p1759_p9 = pneg %p1758_p3  ;;  %p1765_p6 = por %p1764_p12, %p1763_p4 }
  0xc5   : > { %p1766_p13 = pnand %p1765_p6, %p1759_p9 }
  0xc7   : > { %1769 = shalt.err (!%p1766_p13)
}
  0xc8   : > { %s2371_s15 = smov 4   ;;  %s2372_s17 = smov 64  }
  0xc9   : > { %1450 = dma.hbm_to_vmem [thread:$0]  (!%p2153_p10), %s2160_s22, 192, %s2162_s23, %s2164_s21, %s2372_s17, %s2372_s17, %s2371_s15  }
  0xca   : > { %p2373_p1 = scmp.ne.s32.totalorder %s2359_s9, 0 }
  0xcb   : > { %s2198_s20 = sand.u32 (!%p2373_p1), 1, %s1848_s25  }
  0xcc   : > { %331 = sbr.rel (%p2373_p1) target bundleno = 740 (0x2e4), region = 48  ;;  %s334_s1 = scalar_lea.sflag (!%p2373_p1), [#allocation3], %s2198_s20 }
  0xcd   : > { %s1399_s30 = smul.u32 (!%p2373_p1), 12, %s2198_s20 }
  0xcf   : > { %s2202_s16 = scalar_lea.vmem (!%p2373_p1), [#allocation2], %s1399_s30 }
  0xd3   : > { %1823 = dma.done.wait (%p2133_p2), %s334_s1, 192  }
  0xd4   : > { %1825 = vsyncadd (%p2133_p2), %s334_s1, 4294967104  ;;  %p2374_p4 = scmp.ne.s32.totalorder %s2358_s8, 0 }
  0xd6   : > { %1827 = dma.done.wait (%p2374_p4), [#allocation6], 3088  }
  0xd7   : > { %1829 = vsyncadd (%p2374_p4), [#allocation6], 4294964208 }
  0xd8   : > { %1831 = dma.done.wait (%p2374_p4), [#allocation9], 1040  }
  0xd9   : > { %1833 = vsyncadd (%p2374_p4), [#allocation9], 4294966256 }
  0xda   : > { %1835 = dma.done.wait (%p2374_p4), [#allocation12], 1040  }
  0xdb   : > { %1837 = vsyncadd (%p2374_p4), [#allocation12], 4294966256  ;;  %v1875_v0 = vmov 0.0   ;;  %vm1876_vm0 = vmmov 0   ;;  %v1530_v1 = vld [vmem:[#allocation11] sm:$0xff]   ;;  %v1532_v3 = vld [vmem:[#allocation11 + $0x8] sm:$0xff]  }
  0xdc   : > { %1289 = vmatprep.subr.bf16.mxu0 %v1875_v0  ;;  %1309 = vmatprep.subr.bf16.mxu1 %v1875_v0  ;;  %v1531_v2 = vld [vmem:[#allocation5 + $0x40] sm:$0xff]   ;;  %v1533_v4 = vld [vmem:[#allocation5 + $0x48] sm:$0xff]   ;;  %v1534_v5 = vld [vmem:[#allocation11 + $0x10] sm:$0xff]   ;;  %v1877_v14 = vmov 0   ;;  %vm436_vm1 = vsmask.f32 7424 }
  0xdd   : > { %1325 = vmatprep.mubr.msk.bf16.mxu1 %vm1876_vm0, %v1875_v0  ;;  %1305 = vmatprep.mubr.msk.bf16.mxu0 %vm1876_vm0, %v1875_v0  ;;  %v1535_v6 = vld [vmem:[#allocation5 + $0x50] sm:$0xff]   ;;  %v1536_v7 = vld [vmem:[#allocation11 + $0x18] sm:$0xff]   ;;  %v1538_v9 = vld [vmem:[#allocation11 + $0x20] sm:$0xff]   ;;  %vm789_vm2 = vcmask 1046528   ;;  %s1190_s8 = sshll.u32 %s2198_s20, 4  ;;  %s1243_s7 = sshll.u32 %s1856_s27, 8 }
  0xde   : > { %1290 = vmatpush3.bf16.msra.mxu0 %v1530_v1  ;;  %1310 = vmatpush3.bf16.msra.mxu1 %v1531_v2  ;;  %v1537_v8 = vld [vmem:[#allocation5 + $0x58] sm:$0xff]   ;;  %v1539_v10 = vld [vmem:[#allocation5 + $0x60] sm:$0xff]   ;;  %v399_v11 = vld [vmem:[%s2202_s16] sm:$0xf]  ;;  %s391_s9 = scalar_lea.vmem [#allocation14], %s1190_s8  ;;  %s2375_s21 = sld [smem:[#allocation22_spill]] }
  0xdf   : > { %1291 = vmatprep.subr.bf16.mxu0 %v1875_v0  ;;  %1311 = vmatprep.subr.bf16.mxu1 %v1875_v0  ;;  %v400_v12 = vld [vmem:[%s2202_s16 + $0x4] sm:$0xf]  ;;  %v401_v13 = vld [vmem:[%s2202_s16 + $0x8] sm:$0xf]  ;;  %v402_v15 = vmax.bf16 %v1877_v14, %v399_v11  ;;  %v1548_v41 = vld [vmem:[#allocation5] sm:$0xff]   ;;  %s1029_s10 = sshll.u32 %s391_s9, 4  ;;  %s2285_s10 = int_to_ptr.vmem [resolvable:$true] %s1029_s10 }
  0xe0   : > { %v403_v16 = vmax.bf16 %v1877_v14, %v400_v12  ;;  %v404_v17 = vmax.bf16 %v1877_v14, %v401_v13  ;;  %v1192_v18 = vcombine.low %v399_v11, %v400_v12  ;;  %v1540_v19 = vld [vmem:[#allocation11 + $0x28] sm:$0xff]   ;;  %v1193_v20 = vcombine.low %v401_v13, %v401_v13  ;;  %v1542_v25 = vld [vmem:[#allocation11 + $0x30] sm:$0xff]   ;;  %v1544_v34 = vld [vmem:[#allocation11 + $0x38] sm:$0xff]   ;;  %s1014_s12 = scalar_lea.sflag [#allocation4], %s2198_s20  ;;  %s1770_s27 = scalar_lea.vmem %s2285_s10, 256 }
  0xe1   : > { %v1541_v21 = vld [vmem:[#allocation5 + $0x68] sm:$0xff]   ;;  %v1543_v26 = vld [vmem:[#allocation5 + $0x70] sm:$0xff]   ;;  %v1545_v37 = vld [vmem:[#allocation5 + $0x78] sm:$0xff]   ;;  %p1771_p2 = scmp.ne.s32.totalorder %s2285_s10, %s1770_s27  ;;  %p2376_p9 = scmp.ne.s32.totalorder %s2368_s13, 0 }
  0xe2   : > { %1292 = vmatpush3.bf16.msra.mxu0 %v1532_v3  ;;  %1312 = vmatpush3.bf16.msra.mxu1 %v1533_v4  ;;  %v2238_v22 = vcombine.low %v402_v15, %v403_v16  ;;  %v2240_v23 = vcombine.low %v404_v17, %v404_v17  ;;  %v440_v24 = vshll.u32 %v1192_v18, 16  ;;  %v438_v28 = vshrl.u32 %v1192_v18, 16  ;;  %v1549_v43 = vld [vmem:[#allocation5 + $0x80] sm:$0xff]   ;;  %v1550_v44 = vld [vmem:[#allocation5 + $0x8] sm:$0xff]   ;;  %v1552_v46 = vld [vmem:[#allocation5 + $0x10] sm:$0xff]   ;;  %s1878_s2 = smov [#allocation14]  }
  0xe3   : > { %1293 = vmatprep.subr.bf16.mxu0 %v1875_v0  ;;  %1313 = vmatprep.subr.bf16.mxu1 %v1875_v0  ;;  %v445_v29 = vshll.u32 %v1193_v20, 16  ;;  %v1551_v45 = vld [vmem:[#allocation5 + $0x88] sm:$0xff]   ;;  %v1553_v47 = vld [vmem:[#allocation5 + $0x90] sm:$0xff]   ;;  %v1554_v48 = vld [vmem:[#allocation5 + $0x18] sm:$0xff]   ;;  %p1772_p10 = pnand %p1771_p2, %p2376_p9  ;;  %s1774_s15 = sshll.u32 %s1878_s2, 4  ;;  %s1775_s15 = int_to_ptr.vmem [resolvable:$false] %s1774_s15 }
  0xe4   : > { %v583_v27 = vshll.u32 %v2238_v22, 16  ;;  %v581_v30 = vshrl.u32 %v2238_v22, 16  ;;  %v442_v31 = vrot.slane %v440_v24, 1  ;;  %v588_v33 = vshll.u32 %v2240_v23, 16  ;;  %v1555_v49 = vld [vmem:[#allocation5 + $0x98] sm:$0xff]   ;;  %v1556_v50 = vld [vmem:[#allocation5 + $0x20] sm:$0xff]   ;;  %s2290_s18 = scalar_lea.hbm %s2375_s21, %s1243_s7  ;;  %p1777_p0 = scmp.lt.s32.totalorder %s2285_s10, %s1775_s15 }
  0xe5   : > { %v447_v36 = vrot.slane %v445_v29, 1  ;;  %v1557_v51 = vld [vmem:[#allocation5 + $0xa0] sm:$0xff]   ;;  %v1558_v52 = vld [vmem:[#allocation5 + $0x28] sm:$0xff]   ;;  %v1560_v54 = vld [vmem:[#allocation5 + $0x30] sm:$0xff]   ;;  %v790_v58 = vrot.slane %v2238_v22, 1  ;;  %v791_v59 = vrot.slane %v2240_v23, 1  ;;  %p1773_p11 = pneg %p1772_p10 }
  0xe6   : > { %1294 = vmatpush3.bf16.msra.mxu0 %v1534_v5  ;;  %1314 = vmatpush3.bf16.msra.mxu1 %v1535_v6  ;;  %v585_v32 = vrot.slane %v583_v27, 1  ;;  %v443_v35 = vor.u32 %v442_v31, %v438_v28  ;;  %v590_v39 = vrot.slane %v588_v33, 1  ;;  %v1559_v53 = vld [vmem:[#allocation5 + $0xa8] sm:$0xff]   ;;  %v1561_v55 = vld [vmem:[#allocation5 + $0xb0] sm:$0xff]   ;;  %v1562_v56 = vld [vmem:[#allocation5 + $0x38] sm:$0xff]   ;;  %s1776_s17 = scalar_lea.vmem %s1775_s15, 512 }
  0xe7   : > { %1295 = vmatprep.subr.bf16.mxu0 %v1875_v0  ;;  %1315 = vmatprep.subr.bf16.mxu1 %v1875_v0  ;;  %v1563_v57 = vld [vmem:[#allocation5 + $0xb8] sm:$0xff]   ;;  %v792_v60 = vsel %vm789_vm2, %v790_v58, %v791_v59  ;;  %v1564_v61 = vld [vmem:[#allocation8] sm:$0xff]   ;;  %v1565_v62 = vld [vmem:[#allocation8 + $0x8] sm:$0xff]   ;;  %p1778_p7 = scmp.lt.s32.totalorder %s1776_s17, %s1770_s27 }
  0xe8   : > { %v586_v38 = vor.u32 %v585_v32, %v581_v30  ;;  %v448_v40 = vsel %vm436_vm1, %v443_v35, %v447_v36  ;;  %v1566_v63 = vld [vmem:[#allocation8 + $0x10] sm:$0xff]   ;;  %v1567_v1 = vld [vmem:[#allocation8 + $0x18] sm:$0xff]   ;;  %v1568_v2 = vld [vmem:[#allocation8 + $0x20] sm:$0xff]  }
  0xe9   : > { %v1569_v3 = vld [vmem:[#allocation8 + $0x28] sm:$0xff]   ;;  %v1570_v4 = vld [vmem:[#allocation8 + $0x30] sm:$0xff]   ;;  %v1571_v5 = vld [vmem:[#allocation8 + $0x38] sm:$0xff]   ;;  %p1779_p5 = por %p1778_p7, %p1777_p0 }
  0xea   : > { %1296 = vmatpush3.bf16.msra.mxu0 %v1536_v7  ;;  %1316 = vmatpush3.bf16.msra.mxu1 %v1537_v8  ;;  %v591_v42 = vsel %vm436_vm1, %v586_v38, %v590_v39  ;;  %v1228_v14 = vld [vmem:[#allocation7] ss:$0 sm:$0xff]  ;;  %v1191_v27 = vld [vmem:[#allocation13] ss:$0 sm:$0xff]  ;;  %v1229_v28 = vld [vmem:[#allocation10] ss:$0 sm:$0xff] }
  0xeb   : > { %1297 = vmatprep.subr.bf16.mxu0 %v1875_v0  ;;  %1317 = vmatprep.subr.bf16.mxu1 %v1875_v0  ;;  %v1389_v29 = vadd.f32 %v1229_v28, %v1191_v27  ;;  %p1780_p8 = pnand %p1779_p5, %p1773_p11 }
  0xee   : > { %1298 = vmatpush3.bf16.msra.mxu0 %v1538_v9  ;;  %1318 = vmatpush3.bf16.msra.mxu1 %v1539_v10 }
  0xef   : > { %1299 = vmatprep.subr.bf16.mxu0 %v1875_v0  ;;  %1319 = vmatprep.subr.bf16.mxu1 %v1875_v0 }
  0xf2   : > { %1300 = vmatpush3.bf16.msra.mxu0 %v1540_v19  ;;  %1320 = vmatpush3.bf16.msra.mxu1 %v1541_v21 }
  0xf3   : > { %1301 = vmatprep.subr.bf16.mxu0 %v1875_v0  ;;  %1321 = vmatprep.subr.bf16.mxu1 %v1875_v0 }
  0xf6   : > { %1302 = vmatpush3.bf16.msra.mxu0 %v1542_v25  ;;  %1322 = vmatpush3.bf16.msra.mxu1 %v1543_v26 }
  0xf7   : > { %1303 = vmatprep.subr.bf16.mxu0 %v1875_v0  ;;  %1323 = vmatprep.subr.bf16.mxu1 %v1875_v0 }
  0xfa   : > { %1304 = vmatpush3.bf16.msra.mxu0 %v1544_v34  ;;  %1324 = vmatpush3.bf16.msra.mxu1 %v1545_v37 }
  0xfb   : > { %1329 = vmatprep.subr.bf16.mxu0 %v1875_v0  ;;  %1349 = vmatprep.subr.bf16.mxu1 %v1875_v0 }
  0xfd   : > { %1306 = vmatmul.mubr.bf16.vlgmr.msra.gmra.mrb[0].mxu0 %v448_v40  ;;  %1326 = vmatmul.mubr.bf16.vlgmr.msra.gmra.mrb[0].mxu1 %v591_v42 }
  0xfe   : > { %1330 = vmatpush3.bf16.msra.mxu0 %v1548_v41  ;;  %1350 = vmatpush3.bf16.msra.mxu1 %v1549_v43 }
  0xff   : > { %1331 = vmatprep.subr.bf16.mxu0 %v1875_v0  ;;  %1351 = vmatprep.subr.bf16.mxu1 %v1875_v0 }
 0x100   : > { %1345 = vmatprep.mubr.msk.bf16.mxu0 %vm1876_vm0, %v1875_v0  ;;  %1365 = vmatprep.mubr.msk.bf16.mxu1 %vm1876_vm0, %v1875_v0 }
 0x102   : > { %1332 = vmatpush3.bf16.msra.mxu0 %v1550_v44  ;;  %1352 = vmatpush3.bf16.msra.mxu1 %v1551_v45 }
 0x103   : > { %1333 = vmatprep.subr.bf16.mxu0 %v1875_v0  ;;  %1353 = vmatprep.subr.bf16.mxu1 %v1875_v0 }
 0x106   : > { %1334 = vmatpush3.bf16.msra.mxu0 %v1552_v46  ;;  %1354 = vmatpush3.bf16.msra.mxu1 %v1553_v47 }
 0x107   : > { %1335 = vmatprep.subr.bf16.mxu0 %v1875_v0  ;;  %1355 = vmatprep.subr.bf16.mxu1 %v1875_v0 }
 0x10a   : > { %1336 = vmatpush3.bf16.msra.mxu0 %v1554_v48  ;;  %1356 = vmatpush3.bf16.msra.mxu1 %v1555_v49 }
 0x10b   : > { %1337 = vmatprep.subr.bf16.mxu0 %v1875_v0  ;;  %1357 = vmatprep.subr.bf16.mxu1 %v1875_v0 }
 0x10e   : > { %1338 = vmatpush3.bf16.msra.mxu0 %v1556_v50  ;;  %1358 = vmatpush3.bf16.msra.mxu1 %v1557_v51 }
 0x10f   : > { %1339 = vmatprep.subr.bf16.mxu0 %v1875_v0  ;;  %1359 = vmatprep.subr.bf16.mxu1 %v1875_v0 }
 0x112   : > { %1340 = vmatpush3.bf16.msra.mxu0 %v1558_v52  ;;  %1360 = vmatpush3.bf16.msra.mxu1 %v1559_v53 }
 0x113   : > { %1341 = vmatprep.subr.bf16.mxu0 %v1875_v0  ;;  %1361 = vmatprep.subr.bf16.mxu1 %v1875_v0 }
 0x116   : > { %1342 = vmatpush3.bf16.msra.mxu0 %v1560_v54  ;;  %1362 = vmatpush3.bf16.msra.mxu1 %v1561_v55 }
 0x117   : > { %1343 = vmatprep.subr.bf16.mxu0 %v1875_v0  ;;  %1363 = vmatprep.subr.bf16.mxu1 %v1875_v0 }
 0x11a   : > { %1344 = vmatpush3.bf16.msra.mxu0 %v1562_v56  ;;  %1364 = vmatpush3.bf16.msra.mxu1 %v1563_v57 }
 0x11b   : > { %1369 = vmatprep.subr.bf16.mxu0 %v1875_v0 }
 0x11d   : > { %1346 = vmatmul.mubr.bf16.vlgmr.msra.gmra.mrb[4].mxu0 %v2238_v22  ;;  %1366 = vmatmul.mubr.bf16.vlgmr.msra.gmra.mrb[4].mxu1 %v792_v60 }
 0x11e   : > { %1385 = vmatprep.mubr.msk.bf16.mxu0 %vm1876_vm0, %v1875_v0  ;;  %1370 = vmatpush3.bf16.msra.mxu0 %v1564_v61 }
 0x11f   : > { %1371 = vmatprep.subr.bf16.mxu0 %v1875_v0 }
 0x122   : > { %1372 = vmatpush3.bf16.msra.mxu0 %v1565_v62 }
 0x123   : > { %1373 = vmatprep.subr.bf16.mxu0 %v1875_v0 }
 0x126   : > { %1374 = vmatpush3.bf16.msra.mxu0 %v1566_v63 }
 0x127   : > { %1375 = vmatprep.subr.bf16.mxu0 %v1875_v0 }
 0x12a   : > { %1376 = vmatpush3.bf16.msra.mxu0 %v1567_v1 }
 0x12b   : > { %1377 = vmatprep.subr.bf16.mxu0 %v1875_v0 }
 0x12e   : > { %1378 = vmatpush3.bf16.msra.mxu0 %v1568_v2 }
 0x12f   : > { %1379 = vmatprep.subr.bf16.mxu0 %v1875_v0 }
 0x132   : > { %1380 = vmatpush3.bf16.msra.mxu0 %v1569_v3 }
 0x133   : > { %1381 = vmatprep.subr.bf16.mxu0 %v1875_v0 }
 0x136   : > { %1382 = vmatpush3.bf16.msra.mxu0 %v1570_v4 }
 0x137   : > { %1383 = vmatprep.subr.bf16.mxu0 %v1875_v0 }
 0x13a   : > { %1384 = vmatpush3.bf16.msra.mxu0 %v1571_v5 }
 0x1d0   : > { %v675_v6 = vpop.f32.mrb[0].mxu1 }
 0x1d1   : > { %v1327_v7 = vpop.f32.mrb[1].mxu1 }
 0x1d2   : > { %v678_v8 = vpop.f32.mrb[2].mxu1 }
 0x1d3   : > { %v1328_v9 = vpop.f32.mrb[3].mxu1 }
 0x1f0   : > { %v765_v10 = vpop.f32.mrb[4].mxu0  ;;  %v876_v12 = vpop.f32.mrb[4].mxu1 }
 0x1f1   : > { %v766_v11 = vadd.f32 %v765_v10, %v675_v6  ;;  %v1347_v13 = vpop.f32.mrb[5].mxu0  ;;  %v1367_v15 = vpop.f32.mrb[5].mxu1 }
 0x1f2   : > { %v768_v16 = vpop.f32.mrb[6].mxu0  ;;  %v879_v19 = vpop.f32.mrb[6].mxu1 }
 0x1f3   : > { %v883_v17 = vadd.f32 %v876_v12, %v766_v11  ;;  %v769_v18 = vadd.f32 %v768_v16, %v678_v8  ;;  %v1348_v20 = vpop.f32.mrb[7].mxu0  ;;  %v1368_v0 = vpop.f32.mrb[7].mxu1 }
 0x1f5   : > { %v892_v21 = vadd.f32 %v1228_v14, %v883_v17  ;;  %v884_v22 = vadd.f32 %v879_v19, %v769_v18 }
 0x1f7   : > { %v893_v23 = vadd.f32 %v1228_v14, %v884_v22  ;;  %v894_v24 = vmax.f32 %v892_v21, 0.0 }
 0x1f9   : > { %v895_v25 = vmax.f32 %v893_v23, 0.0 }
 0x1fb   : > { %v896_v26 = vpack.c.bf16 %v895_v25, %v894_v24 }
 0x1fd   : > { %1386 = vmatmul.mubr.bf16.vlgmr.msra.gmra.mrb[0].mxu0 %v896_v26 }
 0x2d0   : > { %v1002_v30 = vpop.f32.mrb[0].mxu0 }
 0x2d1   : > { %v1390_v31 = vadd.f32 %v1389_v29, %v1002_v30  ;;  %v1387_v32 = vpop.f32.mrb[1].mxu0 }
 0x2d2   : > { %v1005_v33 = vpop.f32.mrb[2].mxu0 }
 0x2d3   : > { %1011 = vst [vmem:[%s391_s9] sm:$0xff] %v1390_v31  ;;  %v1392_v34 = vadd.f32 %v1389_v29, %v1005_v33  ;;  %v1388_v35 = vpop.f32.mrb[3].mxu0 }
 0x2d5   : > { %1012 = vst [vmem:[%s391_s9 + $0x8] sm:$0xff] %v1392_v34 }
 0x2d6   : > { %1783 = shalt.err (!%p1780_p8)
}
 0x2d7   : > { %s1784_s30 = scalar_lea.hbm %s2290_s18, 256  ;;  %s1788_s8 = scalar_lea.hbm %s2375_s21, 512 }
 0x2d8   : > { %p1785_p3 = scmp.ne.s32.totalorder %s2290_s18, %s1784_s30  ;;  %p1789_p13 = scmp.lt.u32.totalorder %s2290_s18, %s2375_s21 }
 0x2d9   : > { %p1790_p1 = scmp.lt.u32.totalorder %s1788_s8, %s1784_s30  ;;  %p1792_p2 = scmp.lt.u32.totalorder %s1784_s30, %s2290_s18 }
 0x2da   : > { %p1786_p12 = pnand %p1785_p3, %p2376_p9 }
 0x2db   : > { %p1791_p4 = por %p1790_p1, %p1789_p13 }
 0x2dc   : > { %p1787_p6 = pneg %p1786_p12 }
 0x2dd   : > { %p1793_p10 = por %p1792_p2, %p1791_p4 }
 0x2df   : > { %p1794_p11 = pnand %p1793_p10, %p1787_p6 }
 0x2e1   : > { %1797 = shalt.err (!%p1794_p11)
}
 0x2e2   : > { %s1879_s22 = smov 128   ;;  %s1880_s23 = smov 8  }
 0x2e3   : > { %1426 = dma.vmem_to_hbm [thread:$0]  (%p2376_p9), %s2285_s10, 256, %s2290_s18, %s1014_s12, %s1879_s22, %s1879_s22, %s1880_s23  }
 0x2e4 PF: > { %s1044_s27 = sand.u32 1, %s1844_s24   ;;  %p2377_p0 = scmp.ne.s32.totalorder %s2369_s14, 0 }
 0x2e5   : > { %p2378_p7 = scmp.ge.s32.totalorder %s1864_s29, 2  ;;  %s1045_s2 = scalar_lea.sflag [#allocation4], %s1044_s27 }
 0x2e7   : > { %p1452_p5 = pnand %p2378_p7, %p2377_p0 }
 0x2e9   : > { %1839 = dma.done.wait (!%p1452_p5), %s1045_s2, 256  }
 0x2ea   : > { %1841 = vsyncadd (!%p1452_p5), %s1045_s2, 4294967040  ;;  %s26_s29 = sadd.s32 1, %s1864_s29   ;;  %s2379_s24 = smov %s1848_s25 }
 0x2eb   : > { %p23_p8 = scmp.ge.s32.totalorder %s26_s29, 4   ;;  %s2380_s25 = smov %s1852_s26 }
 0x2ec   : > { %s2381_s26 = smov %s2142_s11  ;;  %s2382_s27 = smov %s1860_s28 }
 0x2ed   : > { %s2383_s28 = smov %s2385_s19  ;;  %25 = sbr.rel (!%p23_p8) target bundleno = 13 (0xd), region = 120 }
 0x2f4   :  { %1050 = vsyncpa [#allocation3], 1 }
 0x2f5   :  { %1052 = vsyncpa [#allocation3 + $0x1], 1 }
 0x2f6   :  { %1053 = vsyncpa [#allocation6], 1 }
 0x2f7   :  { %1054 = vsyncpa [#allocation9], 1 }
 0x2f8   :  { %1055 = vsyncpa [#allocation12], 1 }
 0x2f9   :  { %1056 = vsyncpa [#allocation4], 1 }
 0x2fa   :  { %1058 = vsyncpa [#allocation4 + $0x1], 1 }

</bundles_post_ra>
